<compile_context>
chip_gen: v5e
topology: v5e:2x2
jax: 0.10.0
libtpu: 0.0.40
codegen_flags: <defaults>
</compile_context>

<pallas_src>
import jax
import jax.numpy as jnp
import numpy as np
from jax.experimental import pallas as pl
from jax.experimental.pallas import tpu as pltpu


_LANE = 128


def _conv1x1_kernel(w_ref, x_ref, o_ref):
    # w_ref: (C, C)   x_ref / o_ref: (b_tile, C, hw_tile)
    # Weight-stationary batched matmul: z[b] = W @ x[b]; HW is the MXU-N /
    # lane axis, so every store is a lane-dense full-width vst.
    o_ref[...] = jnp.einsum(
        "oc,bcl->bol", w_ref[...], x_ref[...],
        preferred_element_type=jnp.float32,
    ).astype(o_ref.dtype)


def _cdiv(a, b):
    return -(-a // b)


def _target_block_bytes():
    """Bytes-per-step target for one input block (perf-review sizing).

    Bigger blocks amortize per-grid-step overhead; v7x's ~3.2 TB/s HBM wants
    larger blocks, v5e's smaller scoped-VMEM default wants smaller ones.
    """
    try:
        kind = jax.devices()[0].device_kind.lower()
    except Exception:
        kind = ""
    if "v5" in kind:
        return 2 << 20
    if "7x" in kind or "v7" in kind:
        return 8 << 20
    return 4 << 20  # v6e / unknown


def _choose_tiles(n, c, hw, itemsize, target_bytes):
    """Pick (b_tile, hw_tile) from a bytes-per-block target.

    hw_tile is a multiple of 128 (lane axis) unless it covers the whole HW.
    If one image fits comfortably in a block, fold batch items into the block
    instead (amortizes grid-step overhead for small feature maps).  Keeps >=2
    grid blocks whenever the problem allows (v7x has 2 TensorCores).
    """
    max_hw = max(_LANE, (target_bytes // (itemsize * c)) // _LANE * _LANE)
    if hw > max_hw:
        return 1, max_hw  # cdiv grid handles a ragged last spatial block
    hw_tile = hw  # whole image per block (full-dim exemption from 128 rule)
    per_image = c * hw * itemsize
    b_tile = max(1, min(n, target_bytes // max(per_image, 1)))
    if b_tile >= n:  # grid would collapse to (1, 1)
        if n >= 2:
            b_tile = _cdiv(n, 2)  # keep >=2 batch blocks
        elif hw >= 2 * _LANE:
            hw_tile = _cdiv(_cdiv(hw, 2), _LANE) * _LANE  # >=2 spatial blocks
    return b_tile, hw_tile


def invertible_conv1x1(x, weight, logdet=None, reverse=False):
    """Forward of InvertibleConv1x1 (LU_decomposed=False).

    x:      (N, C, H, W) float32, NCHW (PyTorch layout)
    weight: (C, C) float32
    Returns (z, logdet') where
      z       = conv2d(x, weight[..., None, None])   (weight^-1 if reverse)
      logdet' = logdet +/- slogdet(weight)[1] * H * W  (None stays None).
    """
    N, C, H, W = x.shape
    HW = H * W
    itemsize = x.dtype.itemsize

    # TODO(synk): LU_decomposed=True weight parameterization not implemented
    # (module default is LU_decomposed=False).
    if reverse:
        # TODO(synk): PyTorch inverts in float64; with x64 off we refine the
        # f32 inverse with one Newton-Schulz step instead.
        w_inv = jnp.linalg.inv(weight)
        w_eff = w_inv @ (2.0 * jnp.eye(C, dtype=weight.dtype) - weight @ w_inv)
    else:
        w_eff = weight

    b_tile, hw_tile = _choose_tiles(N, C, HW, itemsize, _target_block_bytes())
    grid = (_cdiv(N, b_tile), _cdiv(HW, hw_tile))

    block_bytes = b_tile * C * hw_tile * itemsize
    # double-buffered in + out blocks + weight + slack, clamped for v5e/v7x.
    vmem_bytes = int(min(max(4 * block_bytes + 2 * C * C * 4 + (4 << 20),
                             16 << 20), 48 << 20))

    x2 = x.reshape(N, C, HW)  # contiguous view, no data movement

    cost = pl.CostEstimate(
        flops=2 * N * C * C * HW,
        transcendentals=0,
        bytes_accessed=2 * N * C * HW * itemsize + C * C * 4,
    )

    z2 = pl.pallas_call(
        _conv1x1_kernel,
        out_shape=jax.ShapeDtypeStruct((N, C, HW), x.dtype),
        grid_spec=pltpu.PrefetchScalarGridSpec(
            num_scalar_prefetch=0,
            grid=grid,
            in_specs=[
                pl.BlockSpec((C, C), lambda b, t: (0, 0)),
                pl.BlockSpec((b_tile, C, hw_tile), lambda b, t: (b, 0, t)),
            ],
            out_specs=pl.BlockSpec((b_tile, C, hw_tile), lambda b, t: (b, 0, t)),
        ),
        compiler_params=pltpu.CompilerParams(
            dimension_semantics=("parallel", "parallel"),
            vmem_limit_bytes=vmem_bytes,
        ),
        cost_estimate=cost,
    )(w_eff, x2)
    z = z2.reshape(N, C, H, W)

    if logdet is not None:
        _, logabsdet = jnp.linalg.slogdet(weight)  # tiny CxC, stays in wrapper
        dlogdet = logabsdet * HW
        logdet = logdet - dlogdet if reverse else logdet + dlogdet
    return z, logdet


def _ref_forward(x, weight, logdet=None, reverse=False):
    """Pure-JAX reference mirroring the PyTorch forward (NCHW)."""
    N, C, H, W = x.shape
    w_eff = jnp.linalg.inv(weight) if reverse else weight
    z = jnp.einsum("oc,nchw->nohw", w_eff, x)
    if logdet is not None:
        _, logabsdet = jnp.linalg.slogdet(weight)
        dlogdet = logabsdet * (H * W)
        logdet = logdet - dlogdet if reverse else logdet + dlogdet
    return z, logdet


if __name__ == "__main__":
    num_channels = 8
    N, H, W = 2, 16, 16

    key = jax.random.PRNGKey(0)
    kx, kw, kx2 = jax.random.split(key, 3)
    x = jax.random.normal(kx, (N, num_channels, H, W), jnp.float32)
    # Same init as the module: orthogonal matrix via QR of a random Gaussian.
    w_init = jnp.linalg.qr(
        jax.random.normal(kw, (num_channels, num_channels), jnp.float32))[0]
    logdet0 = jnp.zeros((N,), jnp.float32)

    # ---- forward (reverse=False) ----
    z, logdet = invertible_conv1x1(x, w_init, logdet=logdet0, reverse=False)
    z = jax.block_until_ready(z)
    logdet = jax.block_until_ready(logdet)

    z_ref, logdet_ref = _ref_forward(x, w_init, logdet=logdet0, reverse=False)
    z_ref = jax.block_until_ready(z_ref)

    assert z.shape == (N, num_channels, H, W)
    assert np.max(np.abs(np.asarray(z) - np.asarray(z_ref))) < 1e-4
    assert np.max(np.abs(np.asarray(logdet) - np.asarray(logdet_ref))) < 1e-3

    # ---- reverse path round-trip: conv with W^-1 must recover x, logdet0 ----
    x_rec, logdet_rt = invertible_conv1x1(z, w_init, logdet=logdet, reverse=True)
    x_rec = jax.block_until_ready(x_rec)
    logdet_rt = jax.block_until_ready(logdet_rt)

    assert np.max(np.abs(np.asarray(x_rec) - np.asarray(x))) < 1e-3
    assert np.max(np.abs(np.asarray(logdet_rt) - np.asarray(logdet0))) < 1e-3

    # ---- ragged spatial extent (exercises cdiv grid / partial last block) ----
    xr = jax.random.normal(kx2, (1, num_channels, 30, 30), jnp.float32)
    zr, _ = invertible_conv1x1(xr, w_init, logdet=None, reverse=False)
    zr = jax.block_until_ready(zr)
    zr_ref, _ = _ref_forward(xr, w_init, logdet=None, reverse=False)
    assert np.max(np.abs(np.asarray(zr) - np.asarray(zr_ref))) < 1e-4

    print("KERNEL_OK")
</pallas_src>

<mosaic_0001>
module attributes {stable_mosaic.version = 11 : i64} {
  func.func @_conv1x1_kernel(%arg0: i32, %arg1: i32, %arg2: memref<8x8xf32, #tpu.memory_space<vmem>>, %arg3: memref<1x8x256xf32, #tpu.memory_space<vmem>>, %arg4: memref<1x8x256xf32, #tpu.memory_space<vmem>>) attributes {dimension_semantics = [#tpu.dimension_semantics<parallel>, #tpu.dimension_semantics<parallel>], iteration_bounds = array<i64: 2, 1>, scalar_prefetch = 0 : i64, scratch_operands = 0 : i64, tpu.core_type = #tpu.core_type<tc>, window_params = [{pipeline_mode = #tpu.pipeline_mode<synchronous>, transform_indices = @transform_0, window_bounds = array<i64: 8, 8>}, {transform_indices = @transform_1, window_bounds = array<i64: 1, 8, 256>}, {transform_indices = @transform_2, window_bounds = array<i64: 1, 8, 256>}]} {
    %c0 = arith.constant 0 : index
    %c0_0 = arith.constant 0 : index
    %0 = vector.load %arg2[%c0, %c0_0] : memref<8x8xf32, #tpu.memory_space<vmem>>, vector<8x8xf32>
    %c0_1 = arith.constant 0 : index
    %c0_2 = arith.constant 0 : index
    %c0_3 = arith.constant 0 : index
    %1 = vector.load %arg3[%c0_1, %c0_2, %c0_3] : memref<1x8x256xf32, #tpu.memory_space<vmem>>, vector<1x8x256xf32>
    "tpu.trace_start"() <{level = 10 : i32, message = "oc,bcl->bol"}> : () -> ()
    %cst = arith.constant dense<0.000000e+00> : vector<1x256x8xf32>
    %2 = tpu.matmul %1, %0, %cst {dimension_numbers = #tpu.dot_dimension_numbers<[1], [1], [0, 2], [0], [0, 0, 0, 2, 1, 0], [], []>} : vector<1x8x256xf32>, vector<8x8xf32>, vector<1x256x8xf32> -> vector<1x256x8xf32>
    %3 = tpu.transpose %2, [0, 2, 1] : vector<1x256x8xf32> -> vector<1x8x256xf32>
    "tpu.trace_stop"() : () -> ()
    %c0_4 = arith.constant 0 : index
    %c0_5 = arith.constant 0 : index
    %c0_6 = arith.constant 0 : index
    %4 = vector.load %arg4[%c0_4, %c0_5, %c0_6] : memref<1x8x256xf32, #tpu.memory_space<vmem>>, vector<1x8x256xf32>
    tpu.vector_store %arg4[%c0_4, %c0_5, %c0_6], %3 {strides = array<i32>} : memref<1x8x256xf32, #tpu.memory_space<vmem>>, vector<1x8x256xf32>,
    return
  }
  func.func @transform_0(%arg0: i32, %arg1: i32) -> (i32, i32) {
    %c0_i32 = arith.constant 0 : i32
    %c0_i32_0 = arith.constant 0 : i32
    %c0_i32_1 = arith.constant 0 : i32
    return %c0_i32, %c0_i32_0 : i32, i32
  }
  func.func @transform_1(%arg0: i32, %arg1: i32) -> (i32, i32, i32) {
    %c0_i32 = arith.constant 0 : i32
    %c0_i32_0 = arith.constant 0 : i32
    return %arg0, %c0_i32, %arg1 : i32, i32, i32
  }
  func.func @transform_2(%arg0: i32, %arg1: i32) -> (i32, i32, i32) {
    %c0_i32 = arith.constant 0 : i32
    %c0_i32_0 = arith.constant 0 : i32
    return %arg0, %c0_i32, %arg1 : i32, i32, i32
  }
}

</mosaic_0001>

<bundles_post_ra>
// kernel: tpu_custom_call.1
= control target key start
LH: loop header
LB: loop body
LE: loop exit
PB: predicated region body
PF: predicated region fallthrough
CT: control target
= control target key end

     0   :  { %7 = vsyncpa [#allocation3], 0  ;;  %s1140_s0 = inlined_call_operand.hbm [shape: f32[8,8], index: 0, kind: input, shape index: {}]   ;;  %s1141_s1 = inlined_call_operand.hbm [shape: f32[2,8,256], index: 1, kind: input, shape index: {}]   ;;  %s1142_s2 = inlined_call_operand.hbm [shape: f32[2,8,256], index: 2, kind: output, shape index: {}]  }
   0x1   :  { %8 = vsyncpa [#allocation6], 0 }
   0x2   :  { %10 = vsyncpa [#allocation6 + $0x1], 0 }
   0x3   :  { %11 = vsyncpa [#allocation4], 0 }
   0x4   :  { %13 = vsyncpa [#allocation4 + $0x1], 0  ;;  %s951_s9 = smov 0   ;;  %s953_s10 = smov 0  }
   0x5   :  { %s955_s11 = smov 0   ;;  %s957_s12 = smov 0  }
   0x6   :  { %s959_s13 = smov 0   ;;  %s961_s14 = smov 0  }
   0x7 LB: > { %s658_s15 = sadd.s32 4294967295, %s933_s14   ;;  %s659_s16 = sadd.s32 4294967294, %s933_s14   ;;  %s933_s14 = sphi %s961_s14, %s19_s14   ;;  %s929_s13 = sphi %s959_s13, %s1154_s13   ;;  %s925_s12 = sphi %s957_s12, %s1153_s12   ;;  %s921_s11 = sphi %s955_s11, %s1152_s11   ;;  %s917_s10 = sphi %s953_s10, %s1151_s10   ;;  %s913_s9 = sphi %s951_s9, %s1150_s9  }
   0x8   : > { %p74_p0 = scmp.ne.s32.totalorder %s917_s10, %s913_s9  ;;  %p985_p1 = scmp.eq.s32.totalorder %s658_s15, 0 }
   0x9   : > { %p989_p2 = scmp.eq.s32.totalorder %s658_s15, 1  ;;  %p106_p3 = scmp.eq.s32.totalorder %s659_s16, 1 }
   0xa   : > { %p995_p4 = por %p985_p1, %p74_p0  ;;  %p660_p5 = scmp.ge.s32.totalorder %s933_s14, 1 }
   0xb   : > { %p1000_p6 = por %p106_p3, %p74_p0  ;;  %p113_p7 = scmp.lt.s32.totalorder %s933_s14, 3 }
   0xc   : > { %s125_s23 = sshll.u32 %s1140_s0, 4  ;;  %p662_p9 = scmp.ge.s32.totalorder %s933_s14, 2  ;;  %s126_s23 = int_to_ptr.hbm [resolvable:$true] %s125_s23 }
   0xd   : > { %p1008_p8 = pnand %p660_p5, %p113_p7  ;;  %s935_s25 = smov [#allocation2]  }
   0xe   : > { %s127_s26 = sshll.u32 %s935_s25, 4  ;;  %s31_s27 = sadd.s32 1, %s929_s13  ;;  %s128_s26 = int_to_ptr.vmem [resolvable:$true] %s127_s26 }
   0xf   : > { %p721_p10 = pneg %p1008_p8  ;;  %p33_p12 = scmp.ge.s32.totalorder %s31_s27, 2 }
  0x10   : > { %s61_s28 = sadd.s32 1, %s921_s11  ;;  %p68_p13 = scmp.ne.s32.totalorder %s921_s11, %s917_s10 }
  0x11   : > { %p722_p11 = pnand %p721_p10, %p985_p1  ;;  %p69_p0 = scmp.eq.s32.totalorder %s933_s14, 0 }
  0x12   : > { %s1156_s27 = smov (%p33_p12, %s31_s27), 0  ;;  %p1030_p5 = por %p989_p2, %p68_p13 }
  0x13   : > { %724 = dma.hbm_to_vmem [thread:$0]  (!%p722_p11), %s126_s23, 128, %s128_s26, [#allocation3]  }
  0x14   : > { %p1024_p3 = por %p69_p0, %p68_p13  ;;  %s56_s3 = ssub.s32 %s929_s13, %s1156_s27 }
  0x15   : > { %p734_p7 = scmp.lt.s32.totalorder %s933_s14, 2  ;;  %p59_p10 = scmp.eq.s32.totalorder %s56_s3, 0 }
  0x16   : > { %s138_s4 = sand.u32 1, %s921_s11   ;;  %s708_s7 = sshll.u32 %s929_s13, 4 }
  0x17   : > { %s663_s5 = sshll.u32 %s138_s4, 4  ;;  %s149_s16 = scalar_lea.hbm %s1141_s1, %s708_s7 }
  0x18   : > { %s1039_s6 = scalar_select %p59_p10, %s921_s11, %s61_s28  }
  0x19   : > { %s142_s21 = scalar_lea.vmem [#allocation5], %s663_s5  ;;  %s151_s18 = sshll.u32 %s149_s16, 4  ;;  %s152_s18 = int_to_ptr.hbm [resolvable:$true] %s151_s18 }
  0x1a   : > { %s153_s22 = sshll.u32 %s142_s21, 4  ;;  %p726_p2 = pnand %p734_p7, %p1024_p3  ;;  %s154_s22 = int_to_ptr.vmem [resolvable:$true] %s153_s22 }
  0x1b   : > { %s139_s23 = scalar_lea.sflag [#allocation6], %s138_s4  ;;  %162 = sbr.rel (%p1008_p8) target bundleno = 625 (0x271), region = 28 }
  0x1c   : > { %728 = dma.hbm_to_vmem [thread:$0]  (!%p726_p2), %s152_s18, 256, %s154_s22, %s139_s23  }
  0x20   : > { %900 = dma.done.wait (%p985_p1), [#allocation3], 128  }
  0x21   : > { %902 = vsyncadd (%p985_p1), [#allocation3], 4294967168  ;;  %s1054_s25 = sand.u32 1, %s917_s10  }
  0x22   : > { %s668_s26 = sshll.u32 %s1054_s25, 4  ;;  %s170_s28 = scalar_lea.sflag [#allocation6], %s1054_s25 }
  0x23   : > { %s173_s29 = scalar_lea.vmem [#allocation5], %s668_s26 }
  0x24   : > { %904 = dma.done.wait (%p995_p4), %s170_s28, 256  }
  0x25   : > { %906 = vsyncadd (%p995_p4), %s170_s28, 4294967040  ;;  %v199_v0 = vld [vmem:[%s173_s29 + $0x8] sm:$0xff]  ;;  %vm264_vm0 = vcmask 64512   ;;  %v198_v2 = vld [vmem:[%s173_s29] sm:$0xff]  ;;  %s194_s17 = scalar_lea.vmem [#allocation7], %s668_s26  ;;  %s709_s19 = sshll.u32 %s925_s12, 4 }
  0x26   : > { %232 = vxpose.xlu0.b32.start.end [1/1] (short) %v199_v0, 128  ;;  %v197_v1 = vld [vmem:[#allocation2] sm:$0xff]  ;;  %s557_s4 = scalar_lea.hbm %s1142_s2, %s709_s19  ;;  %s559_s5 = sshll.u32 %s194_s17, 4  ;;  %s560_s5 = int_to_ptr.vmem [resolvable:$true] %s559_s5 }
  0x27   : > { %711 = vmatpush.xpose.msk.msra.mxu2 %vm264_vm0, %v197_v1  ;;  %712 = vmatpush.xpose.msk.msra.mxu3 %vm264_vm0, %v197_v1  ;;  %s561_s7 = sshll.u32 %s557_s4, 4  ;;  %s544_s8 = scalar_lea.sflag [#allocation4], %s1054_s25  ;;  %s562_s7 = int_to_ptr.hbm [resolvable:$true] %s561_s7 }
  0x28   : > { %670 = vmatpush.xpose.msk.msra.mxu0 %vm264_vm0, %v197_v1  ;;  %710 = vmatpush.xpose.msk.msra.mxu1 %vm264_vm0, %v197_v1  ;;  %s861_s15 = sshra.s32 %s562_s7, 4  ;;  %s867_s22 = scalar_lea.hbm %s1142_s2, 32  ;;  %s862_s15 = int_to_ptr.hbm [resolvable:$true] %s861_s15 }
  0x29   : > { %s863_s16 = scalar_lea.hbm %s862_s15, 16  ;;  %p868_p11 = scmp.lt.s32.totalorder %s862_s15, %s1142_s2 }
  0x2a   : > { %p864_p1 = scmp.ne.s32.totalorder %s862_s15, %s863_s16  ;;  %p869_p12 = scmp.lt.s32.totalorder %s867_s22, %s863_s16 }
  0x2c   : > { %p865_p4 = pnand %p864_p1, %p1030_p5  ;;  %p870_p13 = por %p869_p12, %p868_p11 }
  0x2e   : > { %p866_p8 = pneg %p865_p4 }
  0x30   : > { %p871_p0 = pnand %p870_p13, %p866_p8 }
  0xa6   : > { %200 = vxpose.xlu0.b32.start.end [1/1] (short) %v198_v2, 128 }
  0xca   : > { %v248_v3 = vpop.trf.xlu0 }
  0xcb   : > { %687 = vmatmul.msk.f32.vlgmr.msra.gmra.mxu2 %vm264_vm0, %v248_v3 }
  0xd2   : > { %v249_v4 = vpop.trf.xlu0 }
  0xd3   : > { %688 = vmatmul.msk.f32.gmra.mxu2 %vm264_vm0, %v249_v4 }
  0xda   : > { %v250_v5 = vpop.trf.xlu0 }
  0xdb   : > { %689 = vmatmul.msk.f32.gmra.mxu2 %vm264_vm0, %v250_v5 }
  0xe2   : > { %v251_v6 = vpop.trf.xlu0 }
  0xe3   : > { %690 = vmatmul.msk.f32.gmra.mxu2 %vm264_vm0, %v251_v6 }
  0xea   : > { %v252_v7 = vpop.trf.xlu0 }
  0xeb   : > { %691 = vmatmul.msk.f32.gmra.mxu2 %vm264_vm0, %v252_v7 }
  0xf2   : > { %v253_v8 = vpop.trf.xlu0 }
  0xf3   : > { %692 = vmatmul.msk.f32.gmra.mxu2 %vm264_vm0, %v253_v8 }
  0xfa   : > { %v254_v9 = vpop.trf.xlu0 }
  0xfb   : > { %693 = vmatmul.msk.f32.gmra.mxu2 %vm264_vm0, %v254_v9 }
 0x102   : > { %v255_v10 = vpop.trf.xlu0 }
 0x103   : > { %694 = vmatmul.msk.f32.gmra.mxu2 %vm264_vm0, %v255_v10 }
 0x10a   : > { %v256_v11 = vpop.trf.xlu0 }
 0x10b   : > { %695 = vmatmul.msk.f32.vlgmr.msra.gmra.mxu3 %vm264_vm0, %v256_v11 }
 0x112   : > { %v257_v12 = vpop.trf.xlu0 }
 0x113   : > { %696 = vmatmul.msk.f32.gmra.mxu3 %vm264_vm0, %v257_v12 }
 0x11a   : > { %v258_v13 = vpop.trf.xlu0 }
 0x11b   : > { %697 = vmatmul.msk.f32.gmra.mxu3 %vm264_vm0, %v258_v13 }
 0x122   : > { %v259_v14 = vpop.trf.xlu0 }
 0x123   : > { %698 = vmatmul.msk.f32.gmra.mxu3 %vm264_vm0, %v259_v14 }
 0x12a   : > { %v260_v15 = vpop.trf.xlu0 }
 0x12b   : > { %699 = vmatmul.msk.f32.gmra.mxu3 %vm264_vm0, %v260_v15 }
 0x132   : > { %v261_v16 = vpop.trf.xlu0 }
 0x133   : > { %700 = vmatmul.msk.f32.gmra.mxu3 %vm264_vm0, %v261_v16 }
 0x13a   : > { %v262_v17 = vpop.trf.xlu0 }
 0x13b   : > { %701 = vmatmul.msk.f32.gmra.mxu3 %vm264_vm0, %v262_v17 }
 0x142   : > { %v263_v18 = vpop.trf.xlu0 }
 0x143   : > { %702 = vmatmul.msk.f32.gmra.mxu3 %vm264_vm0, %v263_v18 }
 0x14a   : > { %v216_v19 = vpop.trf.xlu0 }
 0x14b   : > { %671 = vmatmul.msk.f32.vlgmr.msra.gmra.mxu0 %vm264_vm0, %v216_v19 }
 0x14e   : > { %v429_v20 = vpop.f32.mrf.mxu2 }
 0x14f   : > { %509 = vxpose.xlu2.b32.start [1/16] (narrow) %v429_v20, 8 }
 0x152   : > { %v217_v21 = vpop.trf.xlu0 }
 0x153   : > { %672 = vmatmul.msk.f32.gmra.mxu0 %vm264_vm0, %v217_v21 }
 0x156   : > { %v432_v22 = vpop.f32.mrf.mxu2 }
 0x157   : > { %510 = vxpose.xlu2.b32.cont [2/16] (narrow) %v432_v22, 8 }
 0x15a   : > { %v218_v23 = vpop.trf.xlu0 }
 0x15b   : > { %673 = vmatmul.msk.f32.gmra.mxu0 %vm264_vm0, %v218_v23 }
 0x15e   : > { %v435_v24 = vpop.f32.mrf.mxu2 }
 0x15f   : > { %511 = vxpose.xlu2.b32.cont [3/16] (narrow) %v435_v24, 8 }
 0x162   : > { %v219_v25 = vpop.trf.xlu0 }
 0x163   : > { %674 = vmatmul.msk.f32.gmra.mxu0 %vm264_vm0, %v219_v25 }
 0x166   : > { %v438_v26 = vpop.f32.mrf.mxu2 }
 0x167   : > { %512 = vxpose.xlu2.b32.cont [4/16] (narrow) %v438_v26, 8 }
 0x16a   : > { %v220_v27 = vpop.trf.xlu0 }
 0x16b   : > { %675 = vmatmul.msk.f32.gmra.mxu0 %vm264_vm0, %v220_v27 }
 0x16e   : > { %v441_v28 = vpop.f32.mrf.mxu2 }
 0x16f   : > { %513 = vxpose.xlu2.b32.cont [5/16] (narrow) %v441_v28, 8 }
 0x172   : > { %v221_v29 = vpop.trf.xlu0 }
 0x173   : > { %676 = vmatmul.msk.f32.gmra.mxu0 %vm264_vm0, %v221_v29 }
 0x176   : > { %v444_v30 = vpop.f32.mrf.mxu2 }
 0x177   : > { %514 = vxpose.xlu2.b32.cont [6/16] (narrow) %v444_v30, 8 }
 0x17a   : > { %v222_v31 = vpop.trf.xlu0 }
 0x17b   : > { %677 = vmatmul.msk.f32.gmra.mxu0 %vm264_vm0, %v222_v31 }
 0x17e   : > { %v447_v32 = vpop.f32.mrf.mxu2 }
 0x17f   : > { %515 = vxpose.xlu2.b32.cont [7/16] (narrow) %v447_v32, 8 }
 0x182   : > { %v223_v33 = vpop.trf.xlu0 }
 0x183   : > { %678 = vmatmul.msk.f32.gmra.mxu0 %vm264_vm0, %v223_v33 }
 0x186   : > { %v450_v34 = vpop.f32.mrf.mxu2 }
 0x187   : > { %516 = vxpose.xlu2.b32.cont [8/16] (narrow) %v450_v34, 8 }
 0x18a   : > { %v224_v35 = vpop.trf.xlu0 }
 0x18b   : > { %679 = vmatmul.msk.f32.vlgmr.msra.gmra.mxu1 %vm264_vm0, %v224_v35 }
 0x18e   : > { %v453_v36 = vpop.f32.mrf.mxu3 }
 0x18f   : > { %517 = vxpose.xlu2.b32.cont [9/16] (narrow) %v453_v36, 8 }
 0x192   : > { %v225_v37 = vpop.trf.xlu0 }
 0x193   : > { %680 = vmatmul.msk.f32.gmra.mxu1 %vm264_vm0, %v225_v37 }
 0x196   : > { %v456_v38 = vpop.f32.mrf.mxu3 }
 0x197   : > { %518 = vxpose.xlu2.b32.cont [10/16] (narrow) %v456_v38, 8 }
 0x19a   : > { %v226_v39 = vpop.trf.xlu0 }
 0x19b   : > { %681 = vmatmul.msk.f32.gmra.mxu1 %vm264_vm0, %v226_v39 }
 0x19e   : > { %v459_v40 = vpop.f32.mrf.mxu3 }
 0x19f   : > { %519 = vxpose.xlu2.b32.cont [11/16] (narrow) %v459_v40, 8 }
 0x1a2   : > { %v227_v41 = vpop.trf.xlu0 }
 0x1a3   : > { %682 = vmatmul.msk.f32.gmra.mxu1 %vm264_vm0, %v227_v41 }
 0x1a6   : > { %v462_v42 = vpop.f32.mrf.mxu3 }
 0x1a7   : > { %520 = vxpose.xlu2.b32.cont [12/16] (narrow) %v462_v42, 8 }
 0x1aa   : > { %v228_v43 = vpop.trf.xlu0 }
 0x1ab   : > { %683 = vmatmul.msk.f32.gmra.mxu1 %vm264_vm0, %v228_v43 }
 0x1ae   : > { %v465_v44 = vpop.f32.mrf.mxu3 }
 0x1af   : > { %521 = vxpose.xlu2.b32.cont [13/16] (narrow) %v465_v44, 8 }
 0x1b2   : > { %v229_v45 = vpop.trf.xlu0 }
 0x1b3   : > { %684 = vmatmul.msk.f32.gmra.mxu1 %vm264_vm0, %v229_v45 }
 0x1b6   : > { %v468_v46 = vpop.f32.mrf.mxu3 }
 0x1b7   : > { %522 = vxpose.xlu2.b32.cont [14/16] (narrow) %v468_v46, 8 }
 0x1ba   : > { %v230_v47 = vpop.trf.xlu0 }
 0x1bb   : > { %685 = vmatmul.msk.f32.gmra.mxu1 %vm264_vm0, %v230_v47 }
 0x1be   : > { %v471_v48 = vpop.f32.mrf.mxu3 }
 0x1bf   : > { %523 = vxpose.xlu2.b32.cont [15/16] (narrow) %v471_v48, 8 }
 0x1c2   : > { %v231_v49 = vpop.trf.xlu0 }
 0x1c3   : > { %686 = vmatmul.msk.f32.gmra.mxu1 %vm264_vm0, %v231_v49 }
 0x1c6   : > { %v474_v50 = vpop.f32.mrf.mxu3 }
 0x1c7   : > { %524 = vxpose.xlu2.b32.end [16/16] (narrow) %v474_v50, 8 }
 0x1c8   : > { %v381_v51 = vpop.f32.mrf.mxu0 }
 0x1c9   : > { %477 = vxpose.xlu1.b32.start [1/16] (narrow) %v381_v51, 8 }
 0x1d0   : > { %v384_v52 = vpop.f32.mrf.mxu0 }
 0x1d1   : > { %478 = vxpose.xlu1.b32.cont [2/16] (narrow) %v384_v52, 8 }
 0x1d8   : > { %v387_v53 = vpop.f32.mrf.mxu0 }
 0x1d9   : > { %479 = vxpose.xlu1.b32.cont [3/16] (narrow) %v387_v53, 8 }
 0x1e0   : > { %v390_v54 = vpop.f32.mrf.mxu0 }
 0x1e1   : > { %480 = vxpose.xlu1.b32.cont [4/16] (narrow) %v390_v54, 8 }
 0x1e8   : > { %v393_v55 = vpop.f32.mrf.mxu0  ;;  %v525_v63 = vpop.trf.xlu2 }
 0x1e9   : > { %481 = vxpose.xlu1.b32.cont [5/16] (narrow) %v393_v55, 8  ;;  %542 = vst [vmem:[%s194_s17 + $0x8] sm:$0xff] %v525_v63 }
 0x1f0   : > { %v396_v56 = vpop.f32.mrf.mxu0 }
 0x1f1   : > { %482 = vxpose.xlu1.b32.cont [6/16] (narrow) %v396_v56, 8 }
 0x1f8   : > { %v399_v57 = vpop.f32.mrf.mxu0 }
 0x1f9   : > { %483 = vxpose.xlu1.b32.cont [7/16] (narrow) %v399_v57, 8 }
 0x200   : > { %v402_v58 = vpop.f32.mrf.mxu0 }
 0x201   : > { %484 = vxpose.xlu1.b32.cont [8/16] (narrow) %v402_v58, 8 }
 0x208   : > { %v405_v59 = vpop.f32.mrf.mxu1 }
 0x209   : > { %485 = vxpose.xlu1.b32.cont [9/16] (narrow) %v405_v59, 8 }
 0x210   : > { %v408_v60 = vpop.f32.mrf.mxu1 }
 0x211   : > { %486 = vxpose.xlu1.b32.cont [10/16] (narrow) %v408_v60, 8 }
 0x218   : > { %v411_v61 = vpop.f32.mrf.mxu1 }
 0x219   : > { %487 = vxpose.xlu1.b32.cont [11/16] (narrow) %v411_v61, 8 }
 0x220   : > { %v414_v62 = vpop.f32.mrf.mxu1 }
 0x221   : > { %488 = vxpose.xlu1.b32.cont [12/16] (narrow) %v414_v62, 8 }
 0x228   : > { %v417_v0 = vpop.f32.mrf.mxu1 }
 0x229   : > { %489 = vxpose.xlu1.b32.cont [13/16] (narrow) %v417_v0, 8 }
 0x230   : > { %v420_v1 = vpop.f32.mrf.mxu1 }
 0x231   : > { %490 = vxpose.xlu1.b32.cont [14/16] (narrow) %v420_v1, 8 }
 0x238   : > { %v423_v2 = vpop.f32.mrf.mxu1 }
 0x239   : > { %491 = vxpose.xlu1.b32.cont [15/16] (narrow) %v423_v2, 8 }
 0x240   : > { %v426_v3 = vpop.f32.mrf.mxu1 }
 0x241   : > { %492 = vxpose.xlu1.b32.end [16/16] (narrow) %v426_v3, 8 }
 0x26d   : > { %v493_v4 = vpop.trf.xlu1 }
 0x26e   : > { %541 = vst [vmem:[%s194_s17] sm:$0xff] %v493_v4 }
 0x26f   : > { %874 = shalt.err (!%p871_p0)
}
 0x270   : > { %719 = dma.vmem_to_hbm [thread:$0]  (%p1030_p5), %s560_s5, 256, %s562_s7, %s544_s8  }
 0x271 PF: > { %s573_s25 = sand.u32 1, %s913_s9   ;;  %p730_p3 = pnand %p662_p9, %p1000_p6 }
 0x272   : > { %s574_s26 = scalar_lea.sflag [#allocation4], %s573_s25 }
 0x273   : > { %p731_p7 = pneg %p730_p3 }
 0x275   : > { %908 = dma.done.wait (%p731_p7), %s574_s26, 256  }
 0x276   : > { %910 = vsyncadd (%p731_p7), %s574_s26, 4294967040  ;;  %s19_s14 = sadd.s32 1, %s933_s14   ;;  %s1150_s9 = smov %s917_s10 }
 0x277   : > { %p16_p10 = scmp.ge.s32.totalorder %s19_s14, 4   ;;  %s1151_s10 = smov %s921_s11 }
 0x278   : > { %s1152_s11 = smov %s1039_s6  ;;  %s1153_s12 = smov %s929_s13 }
 0x279   : > { %s1154_s13 = smov %s1156_s27  ;;  %18 = sbr.rel (!%p16_p10) target bundleno = 7 (0x7), region = 78 }
 0x27e   :  { %580 = vsyncpa [#allocation3], 1 }
 0x27f   :  { %582 = vsyncpa [#allocation3 + $0x1], 1 }
 0x280   :  { %583 = vsyncpa [#allocation6], 1 }
 0x281   :  { %585 = vsyncpa [#allocation6 + $0x1], 1 }
 0x282   :  { %586 = vsyncpa [#allocation4], 1 }
 0x283   :  { %588 = vsyncpa [#allocation4 + $0x1], 1 }

</bundles_post_ra>
